<compile_context>
chip_gen: v6e
topology: v6e:2x2x1
jax: 0.10.0
libtpu: 0.0.40
codegen_flags: <defaults>
</compile_context>

<pallas_src>
import math

import jax
import jax.numpy as jnp
from jax.experimental import pallas as pl
from jax.experimental.pallas import tpu as pltpu


def _drop_path_kernel(scale_ref, x_ref, o_ref):
    """Multiply one token tile by this sample's keep/scale value.

    scale_ref : (1, 1, 1)  x.dtype -- 0.0 (dropped) or 1/keep_prob (kept)
    x_ref     : (1, tm, D) x.dtype
    o_ref     : (1, tm, D) x.dtype
    """
    o_ref[...] = x_ref[...] * scale_ref[...]


def _round_up(a, b):
    return ((a + b - 1) // b) * b


def _pick_block_rows(B, M, D, itemsize, block_bytes):
    """Sublane (token) rows per block for x viewed as (B, M, D)."""
    # dtype packing multiple: 8 for f32, 16 for bf16, 32 for int8/fp8.
    pack = 8 * max(1, 4 // max(1, itemsize))
    if M <= pack:
        return M  # full extent along this dim is always a legal block
    # Largest multiple of `pack` that fits the per-tile byte budget and <= M.
    budget_rows = max(pack, (block_bytes // max(1, D * itemsize)) // pack * pack)
    tm = max(pack, min(budget_rows, (M // pack) * pack))
    # v7x megacore: keep at least 2 grid steps so both TensorCores get work.
    if B * pl.cdiv(M, tm) < 2:
        tm = min(tm, max(pack, _round_up(pl.cdiv(M, 2), pack)))
    return tm


def drop_path(x, key, drop_prob: float = 0.0, training: bool = False,
              scale_by_keep: bool = True, *, block_bytes: int = 2 << 20):
    """JAX/Pallas equivalent of timm's drop_path. `key` is a jax PRNG key."""
    if drop_prob == 0.0 or not training:
        return x
    keep_prob = 1.0 - drop_prob
    B = x.shape[0]

    # View x as (B, M, D).  Identity for the usual ViT (B, tokens, dim) input;
    # otherwise fold middle dims, keeping the last dim (lane-layout friendly).
    if x.ndim >= 3:
        D = x.shape[-1]
        M = int(math.prod(x.shape[1:-1]))
    else:
        D = int(math.prod(x.shape[1:])) if x.ndim > 1 else 1
        M = 1
    x3 = x if x.ndim == 3 else x.reshape(B, M, D)

    # Per-sample keep/scale decision hoisted out of the kernel.  Stored in
    # x.dtype so the in-kernel multiply is a native-dtype VPU op (this matches
    # the torch reference, whose mask tensor is also in x.dtype).
    keep = jax.random.bernoulli(key, p=keep_prob, shape=(B,))
    scale_val = (1.0 / keep_prob) if (keep_prob > 0.0 and scale_by_keep) else 1.0
    scale = jnp.where(keep, jnp.float32(scale_val), jnp.float32(0.0))
    scale = scale.astype(x.dtype).reshape(B, 1, 1)

    itemsize = jnp.dtype(x.dtype).itemsize
    tm = _pick_block_rows(B, M, D, itemsize, block_bytes)
    grid = (B, pl.cdiv(M, tm))

    out = pl.pallas_call(
        _drop_path_kernel,
        out_shape=jax.ShapeDtypeStruct((B, M, D), x.dtype),
        grid_spec=pl.GridSpec(
            grid=grid,
            in_specs=[
                # per-sample scale: index depends only on b -> stays resident
                # across the inner (token-tile) grid axis.
                pl.BlockSpec((1, 1, 1), lambda b, j: (b, 0, 0)),
                pl.BlockSpec((1, tm, D), lambda b, j: (b, j, 0)),
            ],
            out_specs=pl.BlockSpec((1, tm, D), lambda b, j: (b, j, 0)),
        ),
        compiler_params=pltpu.CompilerParams(
            dimension_semantics=("parallel", "parallel"),
        ),
        cost_estimate=pl.CostEstimate(
            flops=x.size,
            transcendentals=0,
            bytes_accessed=2 * x.size * itemsize + B * itemsize,
        ),
    )(scale, x3)

    # TODO(synk): for high drop rates, skip the HBM read of dropped samples by
    # prefetching the keep flags (PrefetchScalarGridSpec) and gating a manual
    # DMA (memory_space=pl.ANY) with pl.when, writing zeros directly instead.
    return out if x.ndim == 3 else out.reshape(x.shape)


class DropPath:
    """Stochastic-depth layer (per-sample drop of the residual branch)."""

    def __init__(self, drop_prob: float = 0.0, scale_by_keep: bool = True):
        self.drop_prob = drop_prob
        self.scale_by_keep = scale_by_keep
        self.training = True

    def __call__(self, x, key, **kwargs):
        return drop_path(x, key, self.drop_prob, self.training,
                         self.scale_by_keep, **kwargs)


def _check_per_sample(x, y, keep_prob, scaled):
    """Each sample must be all-zero or equal to x (optionally /keep_prob)."""
    for b in range(x.shape[0]):
        xb = jnp.asarray(x[b], jnp.float32)
        yb = jnp.asarray(y[b], jnp.float32)
        ref = xb / keep_prob if scaled else xb
        is_zero = bool(jnp.allclose(yb, 0.0))
        is_kept = bool(jnp.allclose(yb, ref, rtol=1e-5, atol=1e-5))
        assert is_zero or is_kept, "per-sample mask not {0, scale}"


if __name__ == "__main__":
    key = jax.random.PRNGKey(0)
    data_key, mask_key, data_key2, data_key3 = jax.random.split(key, 4)

    # Main ViT-style case: (B, tokens, dim), lane-dense D, sublane-aligned N.
    B, N, D = 2, 16, 256
    x = jax.random.normal(data_key, (B, N, D), dtype=jnp.float32)

    layer = DropPath(drop_prob=0.25, scale_by_keep=True)
    layer.training = True
    y = jax.block_until_ready(layer(x, mask_key))
    assert y.shape == x.shape and y.dtype == x.dtype
    _check_per_sample(x, y, keep_prob=0.75, scaled=True)

    # No-scale variant: kept samples equal x exactly.
    layer_ns = DropPath(drop_prob=0.25, scale_by_keep=False)
    layer_ns.training = True
    y_ns = jax.block_until_ready(layer_ns(x, mask_key))
    _check_per_sample(x, y_ns, keep_prob=0.75, scaled=False)

    # Eval mode (identity path).
    layer.training = False
    y_eval = jax.block_until_ready(layer(x, mask_key))
    assert bool(jnp.array_equal(y_eval, x))
    layer.training = True

    # Multi-block grid + masked tail block (odd token count, tiny tile budget).
    x_tail = jax.random.normal(data_key2, (2, 20, 128), dtype=jnp.float32)
    y_tail = jax.block_until_ready(layer(x_tail, mask_key, block_bytes=4096))
    assert y_tail.shape == x_tail.shape
    _check_per_sample(x_tail, y_tail, keep_prob=0.75, scaled=True)

    # 4-D input path (middle dims folded) + bf16 native-dtype multiply.
    x4 = jax.random.normal(data_key3, (2, 4, 4, 128), dtype=jnp.float32)
    y4 = jax.block_until_ready(layer(x4, mask_key))
    assert y4.shape == x4.shape
    _check_per_sample(x4.reshape(2, -1), y4.reshape(2, -1),
                      keep_prob=0.75, scaled=True)

    x_bf = jax.random.normal(data_key, (2, 8, 128), dtype=jnp.bfloat16)
    y_bf = jax.block_until_ready(layer_ns(x_bf, mask_key))
    assert y_bf.dtype == jnp.bfloat16 and y_bf.shape == x_bf.shape
    _check_per_sample(x_bf, y_bf, keep_prob=0.75, scaled=False)

    print("KERNEL_OK")
</pallas_src>

<mosaic_0001>
module attributes {stable_mosaic.version = 11 : i64} {
  func.func @_drop_path_kernel(%arg0: i32, %arg1: i32, %arg2: memref<1x1x1xf32, #tpu.memory_space<vmem>>, %arg3: memref<1x16x256xf32, #tpu.memory_space<vmem>>, %arg4: memref<1x16x256xf32, #tpu.memory_space<vmem>>) attributes {dimension_semantics = [#tpu.dimension_semantics<parallel>, #tpu.dimension_semantics<parallel>], iteration_bounds = array<i64: 2, 1>, scalar_prefetch = 0 : i64, scratch_operands = 0 : i64, tpu.core_type = #tpu.core_type<tc>, window_params = [{transform_indices = @transform_0, window_bounds = array<i64: 1, 1, 1>}, {transform_indices = @transform_1, window_bounds = array<i64: 1, 16, 256>}, {transform_indices = @transform_2, window_bounds = array<i64: 1, 16, 256>}]} {
    %c0 = arith.constant 0 : index
    %c0_0 = arith.constant 0 : index
    %c0_1 = arith.constant 0 : index
    %0 = vector.load %arg3[%c0, %c0_0, %c0_1] : memref<1x16x256xf32, #tpu.memory_space<vmem>>, vector<1x16x256xf32>
    %c0_2 = arith.constant 0 : index
    %c0_3 = arith.constant 0 : index
    %c0_4 = arith.constant 0 : index
    %1 = vector.load %arg2[%c0_2, %c0_3, %c0_4] : memref<1x1x1xf32, #tpu.memory_space<vmem>>, vector<1x1x1xf32>
    %2 = vector.broadcast %1 : vector<1x1x1xf32> to vector<1x16x256xf32>
    %3 = arith.mulf %0, %2 : vector<1x16x256xf32>
    %c0_5 = arith.constant 0 : index
    %c0_6 = arith.constant 0 : index
    %c0_7 = arith.constant 0 : index
    %4 = vector.load %arg4[%c0_5, %c0_6, %c0_7] : memref<1x16x256xf32, #tpu.memory_space<vmem>>, vector<1x16x256xf32>
    tpu.vector_store %arg4[%c0_5, %c0_6, %c0_7], %3 {strides = array<i32>} : memref<1x16x256xf32, #tpu.memory_space<vmem>>, vector<1x16x256xf32>,
    return
  }
  func.func @transform_0(%arg0: i32, %arg1: i32) -> (i32, i32, i32) {
    %c0_i32 = arith.constant 0 : i32
    %c0_i32_0 = arith.constant 0 : i32
    %c0_i32_1 = arith.constant 0 : i32
    return %arg0, %c0_i32, %c0_i32_0 : i32, i32, i32
  }
  func.func @transform_1(%arg0: i32, %arg1: i32) -> (i32, i32, i32) {
    %c0_i32 = arith.constant 0 : i32
    %c0_i32_0 = arith.constant 0 : i32
    return %arg0, %arg1, %c0_i32 : i32, i32, i32
  }
  func.func @transform_2(%arg0: i32, %arg1: i32) -> (i32, i32, i32) {
    %c0_i32 = arith.constant 0 : i32
    %c0_i32_0 = arith.constant 0 : i32
    return %arg0, %arg1, %c0_i32 : i32, i32, i32
  }
}

</mosaic_0001>

<bundles_post_ra>
// kernel: tpu_custom_call.1
= control target key start
LH: loop header
LB: loop body
LE: loop exit
PB: predicated region body
PF: predicated region fallthrough
CT: control target
= control target key end

     0   :  { %7 = vsyncpa [#allocation3], 0  ;;  %s701_s0 = inlined_call_operand.vmem [shape: f32[2,1,1], index: 0, kind: input, shape index: {}]   ;;  %s702_s1 = inlined_call_operand.hbm [shape: f32[2,16,256], index: 1, kind: input, shape index: {}]   ;;  %s703_s2 = inlined_call_operand.hbm [shape: f32[2,16,256], index: 2, kind: output, shape index: {}]  }
   0x1   :  { %9 = vsyncpa [#allocation3 + $0x1], 0 }
   0x2   :  { %10 = vsyncpa [#allocation4], 0 }
   0x3   :  { %12 = vsyncpa [#allocation4 + $0x1], 0  ;;  %s550_s9 = smov 0   ;;  %s552_s10 = smov 0  }
   0x4   :  { %s554_s11 = smov 0   ;;  %s556_s12 = smov 0  }
   0x5   :  { %s558_s13 = smov 0   ;;  %s560_s14 = smov 0  }
   0x6 LB: > { %s332_s15 = sadd.s32 4294967295, %s526_s14   ;;  %s333_s16 = sadd.s32 4294967294, %s526_s14   ;;  %s526_s14 = sphi %s560_s14, %s18_s14   ;;  %s522_s13 = sphi %s558_s13, %s714_s13   ;;  %s518_s12 = sphi %s556_s12, %s713_s12   ;;  %s514_s11 = sphi %s554_s11, %s712_s11   ;;  %s510_s10 = sphi %s552_s10, %s711_s10   ;;  %s506_s9 = sphi %s550_s9, %s710_s9  }
   0x7   : > { %s30_s17 = sadd.s32 1, %s522_s13  ;;  %s65_s18 = sadd.s32 1, %s514_s11 }
   0x8   : > { %p32_p0 = scmp.ge.s32.totalorder %s30_s17, 2  ;;  %p72_p1 = scmp.ne.s32.totalorder %s514_s11, %s510_s10 }
   0x9   : > { %p73_p2 = scmp.eq.s32.totalorder %s526_s14, 0  ;;  %p78_p3 = scmp.ne.s32.totalorder %s510_s10, %s506_s9 }
   0xa   : > { %s716_s17 = smov (%p32_p0, %s30_s17), 0  ;;  %p79_p5 = scmp.eq.s32.totalorder %s332_s15, 0 }
   0xb   : > { %p591_p4 = por %p73_p2, %p72_p1  ;;  %s60_s20 = ssub.s32 %s522_s13, %s716_s17 }
   0xc   : > { %p104_p6 = scmp.eq.s32.totalorder %s332_s15, 1  ;;  %p63_p7 = scmp.eq.s32.totalorder %s60_s20, 0 }
   0xd   : > { %p597_p8 = por %p79_p5, %p78_p3  ;;  %p110_p10 = scmp.eq.s32.totalorder %s333_s16, 1 }
   0xe   : > { %p601_p9 = por %p104_p6, %p72_p1  ;;  %p362_p13 = scmp.lt.s32.totalorder %s526_s14, 2 }
   0xf   : > { %s606_s23 = scalar_select %p63_p7, %s514_s11, %s65_s18  }
  0x10   : > { %p608_p11 = por %p110_p10, %p78_p3  ;;  %s136_s25 = sand.u32 1, %s514_s11  }
  0x11   : > { %s336_s26 = sshll.u32 %s136_s25, 5  ;;  %s348_s27 = sshll.u32 %s522_s13, 9 }
  0x12   : > { %s149_s30 = scalar_lea.hbm %s702_s1, %s348_s27  ;;  %s140_s3 = scalar_lea.vmem [#allocation2], %s336_s26 }
  0x13   : > { %s150_s4 = sshll.u32 %s140_s3, 4  ;;  %p621_p0 = pnand %p362_p13, %p591_p4  ;;  %s151_s4 = int_to_ptr.vmem [resolvable:$true] %s150_s4 }
  0x14   : > { %p339_p1 = scmp.ge.s32.totalorder %s526_s14, 1  ;;  %s137_s6 = scalar_lea.sflag [#allocation3], %s136_s25 }
  0x15   : > { %p420_p2 = pneg %p621_p0  ;;  %s431_s7 = scalar_lea.vmem %s151_s4, 512 }
  0x16   : > { %p432_p3 = scmp.ne.s32.totalorder %s151_s4, %s431_s7  ;;  %s528_s8 = smov [#allocation2]  }
  0x17   : > { %s436_s15 = sshll.u32 %s528_s8, 4  ;;  %s437_s15 = int_to_ptr.vmem [resolvable:$false] %s436_s15 }
  0x18   : > { %p434_p5 = pnand %p432_p3, %p420_p2  ;;  %s438_s16 = scalar_lea.vmem %s437_s15, 1024 }
  0x19   : > { %p439_p7 = scmp.lt.s32.totalorder %s151_s4, %s437_s15  ;;  %p440_p10 = scmp.lt.s32.totalorder %s438_s16, %s431_s7 }
  0x1a   : > { %p435_p6 = pneg %p434_p5 }
  0x1b   : > { %p441_p12 = por %p440_p10, %p439_p7 }
  0x1d   : > { %p442_p4 = pnand %p441_p12, %p435_p6 }
  0x1f   : > { %445 = shalt.err (!%p442_p4)
}
  0x20   : > { %s529_s18 = smov 256   ;;  %s530_s19 = smov 16  }
  0x21   : > { %357 = dma.hbm_to_vmem [thread:$0]  (!%p621_p0), %s149_s30, 512, %s151_s4, %s137_s6, %s529_s18, %s529_s18, %s530_s19  }
  0x22   : > { %p158_p13 = scmp.lt.s32.totalorder %s526_s14, 3 }
  0x24   : > { %p159_p2 = pnand %p339_p1, %p158_p13 }
  0x25   : > { %s634_s20 = sand.u32 (!%p159_p2), 1, %s510_s10  }
  0x26   : > { %162 = sbr.rel (%p159_p2) target bundleno = 191 (0xbf), region = 28  ;;  %s340_s25 = sshll.u32 (!%p159_p2), %s634_s20, 5 }
  0x27   : > { %s165_s26 = scalar_lea.sflag (!%p159_p2), [#allocation3], %s634_s20  ;;  %s168_s27 = scalar_lea.vmem (!%p159_p2), [#allocation2], %s340_s25 }
  0x2b   : > { %497 = dma.done.wait (%p597_p8), %s165_s26, 512  }
  0x2c   : > { %499 = vsyncadd (%p597_p8), %s165_s26, 4294966784  ;;  %p192_p12 = scmp.lt.s32.totalorder %s518_s12, 1  ;;  %v531_v0 = vmov 0   ;;  %s191_s4 = scalar_lea.vmem [#allocation5], %s340_s25  ;;  %v197_v2 = vld [vmem:[%s168_s27] sm:$0xff]  ;;  %v198_v3 = vld [vmem:[%s168_s27 + $0x8] sm:$0xff] }
  0x2d   : > { %417 = vset.pattern.permute.xlu0 %v531_v0  ;;  %s236_s5 = sshll.u32 %s191_s4, 4  ;;  %s349_s6 = sshll.u32 %s518_s12, 9  ;;  %v199_v4 = vld [vmem:[%s168_s27 + $0x10] sm:$0xff]  ;;  %v200_v5 = vld [vmem:[%s168_s27 + $0x18] sm:$0xff]  ;;  %s648_s5 = int_to_ptr.vmem [resolvable:$true] %s236_s5 }
  0x2e   : > { %s193_s28 = scalar_select %p192_p12, %s518_s12, 1 }
  0x2f   : > { %s653_s8 = scalar_lea.hbm %s703_s2, %s349_s6  ;;  %s220_s12 = scalar_lea.sflag [#allocation4], %s634_s20 }
  0x30   : > { %s194_s3 = scalar_lea.vmem %s701_s0, %s193_s28  ;;  %s446_s15 = scalar_lea.vmem %s648_s5, 512 }
  0x31   : > { %v342_v1 = vld [vmem:[%s194_s3] ss:$0 sm:$0xff]  ;;  %p447_p8 = scmp.ne.s32.totalorder %s648_s5, %s446_s15  ;;  %s532_s16 = smov [#allocation5]  }
  0x32   : > { %208 = vperm.xlu0 %417, %v342_v1   ;;  %s450_s18 = sshll.u32 %s532_s16, 4  ;;  %s451_s18 = int_to_ptr.vmem [resolvable:$false] %s450_s18 }
  0x33   : > { %p448_p0 = pnand %p447_p8, %p601_p9  ;;  %s452_s19 = scalar_lea.vmem %s451_s18, 1024 }
  0x34   : > { %p453_p3 = scmp.lt.s32.totalorder %s648_s5, %s451_s18  ;;  %p454_p5 = scmp.lt.s32.totalorder %s452_s19, %s446_s15 }
  0x35   : > { %p449_p1 = pneg %p448_p0 }
  0x36   : > { %p455_p6 = por %p454_p5, %p453_p3 }
  0x38   : > { %p456_p7 = pnand %p455_p6, %p449_p1 }
  0xad   : > { %v209_v6 = vpop.permute.xlu0 %208 }
  0xae   : > { %v211_v7 = vmul.f32 %v209_v6, %v197_v2  ;;  %v212_v8 = vmul.f32 %v209_v6, %v198_v3  ;;  %v213_v9 = vmul.f32 %v209_v6, %v199_v4  ;;  %v214_v10 = vmul.f32 %v209_v6, %v200_v5 }
  0xb0   : > { %215 = vst [vmem:[%s191_s4] sm:$0xff] %v211_v7  ;;  %216 = vst [vmem:[%s191_s4 + $0x8] sm:$0xff] %v212_v8 }
  0xb1   : > { %217 = vst [vmem:[%s191_s4 + $0x10] sm:$0xff] %v213_v9  ;;  %218 = vst [vmem:[%s191_s4 + $0x18] sm:$0xff] %v214_v10 }
  0xb2   : > { %459 = shalt.err (!%p456_p7)
}
  0xb3   : > { %s460_s25 = scalar_lea.hbm %s653_s8, 512  ;;  %s464_s28 = scalar_lea.hbm %s703_s2, 1024 }
  0xb4   : > { %p461_p10 = scmp.ne.s32.totalorder %s653_s8, %s460_s25  ;;  %p465_p2 = scmp.lt.s32.totalorder %s653_s8, %s703_s2 }
  0xb5   : > { %p466_p12 = scmp.lt.s32.totalorder %s464_s28, %s460_s25 }
  0xb6   : > { %p462_p4 = pnand %p461_p10, %p601_p9 }
  0xb7   : > { %p467_p8 = por %p466_p12, %p465_p2 }
  0xb8   : > { %p463_p13 = pneg %p462_p4 }
  0xba   : > { %p468_p0 = pnand %p467_p8, %p463_p13 }
  0xbc   : > { %471 = shalt.err (!%p468_p0)
}
  0xbd   : > { %s533_s3 = smov 256   ;;  %s534_s4 = smov 16  }
  0xbe   : > { %352 = dma.vmem_to_hbm [thread:$0]  (%p601_p9), %s648_s5, 512, %s653_s8, %s220_s12, %s533_s3, %s533_s3, %s534_s4  }
  0xbf PF: > { %s251_s6 = sand.u32 1, %s506_s9   ;;  %p709_p1 = scmp.ge.s32.totalorder %s526_s14, 2 }
  0xc0   : > { %s252_s21 = scalar_lea.sflag [#allocation4], %s251_s6 }
  0xc1   : > { %p359_p3 = pnand %p709_p1, %p608_p11 }
  0xc3   : > { %p360_p5 = pneg %p359_p3 }
  0xc5   : > { %501 = dma.done.wait (%p360_p5), %s252_s21, 512  }
  0xc6   : > { %503 = vsyncadd (%p360_p5), %s252_s21, 4294966784  ;;  %s18_s14 = sadd.s32 1, %s526_s14   ;;  %s710_s9 = smov %s510_s10 }
  0xc7   : > { %p15_p6 = scmp.ge.s32.totalorder %s18_s14, 4   ;;  %s711_s10 = smov %s514_s11 }
  0xc8   : > { %s712_s11 = smov %s606_s23  ;;  %s713_s12 = smov %s522_s13 }
  0xc9   : > { %s714_s13 = smov %s716_s17  ;;  %17 = sbr.rel (!%p15_p6) target bundleno = 6 (0x6), region = 76 }
  0xce   :  { %257 = vsyncpa [#allocation3], 1 }
  0xcf   :  { %259 = vsyncpa [#allocation3 + $0x1], 1 }
  0xd0   :  { %260 = vsyncpa [#allocation4], 1 }
  0xd1   :  { %262 = vsyncpa [#allocation4 + $0x1], 1 }

</bundles_post_ra>
